<compile_context>
chip_gen: v6e
topology: v6e:2x2x1
jax: 0.10.0
libtpu: 0.0.40
codegen_flags: <defaults>
</compile_context>

<pallas_src>
import functools
import math

import jax
import jax.numpy as jnp
from jax.experimental import pallas as pl
from jax.experimental.pallas import tpu as pltpu


def _elasticnet_kernel(x_ref, w_ref, b_ref, o_ref):
    # x_ref: (TB, F) VMEM   w_ref: (1, F) VMEM   b_ref: (1,) SMEM   o_ref: (TB, 1)
    x = x_ref[...]
    w = w_ref[...]                       # (1, F) broadcasts over the batch tile
    bias = b_ref[0]                      # scalar read from SMEM

    # Output width is 1, so skip the MXU entirely: VPU elementwise multiply
    # followed by an XLU lane reduction, accumulated in f32.
    acc = jnp.sum(
        x.astype(jnp.float32) * w.astype(jnp.float32),
        axis=-1,
        keepdims=True,
    )
    o_ref[...] = (acc + bias).astype(o_ref.dtype)


def _choose_batch_tile(batch, n_features, dtype_bytes,
                       target_bytes=2 << 20, max_tile=2048):
    """Pick a batch tile so the x block is ~2 MiB, a multiple of 8 sublanes."""
    rows = target_bytes // max(1, n_features * dtype_bytes)
    tb = int(max(8, min(max_tile, rows)))
    tb -= tb % 8
    tb = max(tb, 8)
    b_pad8 = ((batch + 7) // 8) * 8      # never exceed the (padded) batch
    return min(tb, b_pad8)


@functools.partial(jax.jit, static_argnames=("block_batch",))
def elasticnet_forward(x, weight, bias, *, block_batch=None):
    """Pallas equivalent of ElasticNet.forward: y = x @ W.T + b, shape (B, 1)."""
    B, F = x.shape
    assert weight.shape == (1, F)
    dtype_bytes = jnp.dtype(x.dtype).itemsize

    tb = block_batch if block_batch is not None else _choose_batch_tile(
        B, F, dtype_bytes)
    assert tb % 8 == 0, "batch tile must be a multiple of 8 sublanes"

    grid = pl.cdiv(B, tb)
    b_pad = grid * tb
    if b_pad != B:
        # Zero-pad the tail tile; pad rows are sliced off below.
        x = jnp.pad(x, ((0, b_pad - B), (0, 0)))

    cost = pl.CostEstimate(
        flops=2 * b_pad * F,
        transcendentals=0,
        bytes_accessed=b_pad * F * dtype_bytes          # x read (dominant)
        + F * weight.dtype.itemsize                     # weight read
        + b_pad * dtype_bytes,                          # output write
    )

    out = pl.pallas_call(
        _elasticnet_kernel,
        out_shape=jax.ShapeDtypeStruct((b_pad, 1), x.dtype),
        grid=(grid,),
        in_specs=[
            # x: streamed batch tiles, double-buffered by the Pallas pipeline.
            pl.BlockSpec((tb, F), lambda i: (i, 0)),
            # weight: constant block, stays resident in VMEM.
            pl.BlockSpec((1, F), lambda i: (0, 0)),
            # bias: single scalar, keep it in SMEM.
            pl.BlockSpec(memory_space=pltpu.MemorySpace.SMEM),
        ],
        out_specs=pl.BlockSpec((tb, 1), lambda i: (i, 0)),
        compiler_params=pltpu.CompilerParams(
            dimension_semantics=("parallel",),   # megacore sharding on v7x
        ),
        cost_estimate=cost,
    )(x, weight, bias)

    return out[:B]


def init_elasticnet_params(key, n_features):
    """Deterministic init mirroring torch.nn.Linear default (uniform +/- 1/sqrt(F))."""
    kw, kb = jax.random.split(key)
    bound = 1.0 / math.sqrt(n_features)
    weight = jax.random.uniform(
        kw, (1, n_features), dtype=jnp.float32, minval=-bound, maxval=bound
    )
    bias = jax.random.uniform(
        kb, (1,), dtype=jnp.float32, minval=-bound, maxval=bound
    )
    return weight, bias


if __name__ == "__main__":
    # TODO(synk): ElasticNet.loss (L1/L2 penalty + MSE) is training-time glue,
    # not part of forward(); left unimplemented in the kernel.
    key = jax.random.PRNGKey(0)
    k_x, k_p = jax.random.split(key)

    batch, n_features = 8, 32
    x = jax.random.normal(k_x, (batch, n_features), dtype=jnp.float32)
    weight, bias = init_elasticnet_params(k_p, n_features)

    out = elasticnet_forward(x, weight, bias)
    out = jax.block_until_ready(out)

    ref = x @ weight.T + bias.reshape(1, 1)
    assert out.shape == (batch, 1)
    assert jnp.allclose(out, ref, atol=1e-5, rtol=1e-5)

    # Also exercise the multi-tile + ragged-tail path (B=300, TB=128 -> 3 tiles,
    # 84 padded rows that must be masked out of the result).
    batch2 = 300
    x2 = jax.random.normal(k_x, (batch2, n_features), dtype=jnp.float32)
    out2 = jax.block_until_ready(
        elasticnet_forward(x2, weight, bias, block_batch=128))
    ref2 = x2 @ weight.T + bias.reshape(1, 1)
    assert out2.shape == (batch2, 1)
    assert jnp.allclose(out2, ref2, atol=1e-5, rtol=1e-5)

    print("KERNEL_OK")
</pallas_src>

<mosaic_0001>
module attributes {stable_mosaic.version = 11 : i64} {
  func.func @_elasticnet_kernel(%arg0: i32, %arg1: memref<8x32xf32, #tpu.memory_space<vmem>>, %arg2: memref<1x32xf32, #tpu.memory_space<vmem>>, %arg3: memref<1xf32, #tpu.memory_space<smem>>, %arg4: memref<8x1xf32, #tpu.memory_space<vmem>>) attributes {dimension_semantics = [#tpu.dimension_semantics<parallel>], iteration_bounds = array<i64: 1>, scalar_prefetch = 0 : i64, scratch_operands = 0 : i64, tpu.core_type = #tpu.core_type<tc>, window_params = [{transform_indices = @transform_0, window_bounds = array<i64: 8, 32>}, {pipeline_mode = #tpu.pipeline_mode<synchronous>, transform_indices = @transform_1, window_bounds = array<i64: 1, 32>}, {transform_indices = @transform_2, window_bounds = array<i64: 1>}, {transform_indices = @transform_3, window_bounds = array<i64: 8, 1>}]} {
    %c0 = arith.constant 0 : index
    %c0_0 = arith.constant 0 : index
    %0 = vector.load %arg1[%c0, %c0_0] : memref<8x32xf32, #tpu.memory_space<vmem>>, vector<8x32xf32>
    %c0_1 = arith.constant 0 : index
    %c0_2 = arith.constant 0 : index
    %1 = vector.load %arg2[%c0_1, %c0_2] : memref<1x32xf32, #tpu.memory_space<vmem>>, vector<1x32xf32>
    %c0_3 = arith.constant 0 : index
    %2 = memref.load %arg3[%c0_3] : memref<1xf32, #tpu.memory_space<smem>>
    %3 = vector.broadcast %1 : vector<1x32xf32> to vector<8x32xf32>
    %4 = arith.mulf %0, %3 : vector<8x32xf32>
    %cst = arith.constant dense<0.000000e+00> : vector<8xf32>
    %5 = vector.multi_reduction <add>, %4, %cst [1] : vector<8x32xf32> to vector<8xf32>
    %6 = vector.shape_cast %5 : vector<8xf32> to vector<8x1xf32>
    %7 = vector.broadcast %2 : f32 to vector<8x1xf32>
    %8 = arith.addf %6, %7 : vector<8x1xf32>
    %c0_4 = arith.constant 0 : index
    %c0_5 = arith.constant 0 : index
    %9 = vector.load %arg4[%c0_4, %c0_5] : memref<8x1xf32, #tpu.memory_space<vmem>>, vector<8x1xf32>
    tpu.vector_store %arg4[%c0_4, %c0_5], %8 {strides = array<i32>} : memref<8x1xf32, #tpu.memory_space<vmem>>, vector<8x1xf32>,
    return
  }
  func.func @transform_0(%arg0: i32) -> (i32, i32) {
    %c0_i32 = arith.constant 0 : i32
    %c0_i32_0 = arith.constant 0 : i32
    return %arg0, %c0_i32 : i32, i32
  }
  func.func @transform_1(%arg0: i32) -> (i32, i32) {
    %c0_i32 = arith.constant 0 : i32
    %c0_i32_0 = arith.constant 0 : i32
    %c0_i32_1 = arith.constant 0 : i32
    return %c0_i32, %c0_i32_0 : i32, i32
  }
  func.func @transform_2(%arg0: i32) -> i32 {
    %c0_i32 = arith.constant 0 : i32
    %c0_i32_0 = arith.constant 0 : i32
    return %c0_i32 : i32
  }
  func.func @transform_3(%arg0: i32) -> (i32, i32) {
    %c0_i32 = arith.constant 0 : i32
    %c0_i32_0 = arith.constant 0 : i32
    return %arg0, %c0_i32 : i32, i32
  }
}

</mosaic_0001>

<bundles_post_ra>
// kernel: elasticnet_forward.1
= control target key start
LH: loop header
LB: loop body
LE: loop exit
PB: predicated region body
PF: predicated region fallthrough
CT: control target
= control target key end

     0   :  { %9 = vsyncpa [#allocation4], 0  ;;  %s74_s12 = smov [#allocation3]   ;;  %s107_s0 = inlined_call_operand.hbm [shape: f32[8,32], index: 0, kind: input, shape index: {}]   ;;  %s108_s1 = inlined_call_operand.vmem [shape: f32[1,32], index: 1, kind: input, shape index: {}]   ;;  %s109_s2 = inlined_call_operand.<no memory space> [shape: f32[1], index: 2, kind: input, shape index: {}]   ;;  %s110_s3 = inlined_call_operand.vmem [shape: f32[8,1], index: 3, kind: output, shape index: {}]  }
   0x1   :  { %s16_s13 = sshll.u32 %s74_s12, 4  ;;  %s17_s13 = int_to_ptr.vmem [resolvable:$true] %s16_s13 }
   0x2   :  { %s60_s14 = scalar_lea.vmem %s17_s13, 128  ;;  %p65_p1 = scmp.lt.s32.totalorder %s17_s13, %s17_s13 }
   0x3   :  { %p61_p0 = scmp.ne.s32.totalorder %s17_s13, %s60_s14  ;;  %p66_p2 = scmp.lt.s32.totalorder %s60_s14, %s60_s14 }
   0x5   :  { %p67_p3 = por %p66_p2, %p65_p1 }
   0x7   :  { %p68_p4 = pnand %p67_p3, %p61_p0 }
   0x9   :  { %71 = shalt.err (!%p68_p4)
}
   0xa   :  { %19 = dma.hbm_to_vmem [thread:$0]  %s107_s0, 128, %s17_s13, [#allocation4]  }
   0xb   :  { %72 = dma.done.wait [#allocation4], 128  }
   0xc   :  { %73 = vsyncadd [#allocation4], 4294967168  ;;  %v27_v0 = vld [vmem:[#allocation3] sm:$0xff]  ;;  %vm37_vm0 = vcmask 261120   ;;  %v41_v4 = vstv %s109_s2  ;;  %vm43_vm1 = vcmask 7168  }
   0xd   :  { %v50_v1 = vld [vmem:[%s108_s1] ss:$0 sm:$0xff] }
   0xe   :  { %v36_v2 = vmul.f32 %v50_v1, %v27_v0 }
  0x10   :  { %v38_v3 = vsel %vm37_vm0, %v36_v2, 0.0 }
  0x11   :  { %39 = vadd.xlane.f32.xlu0 %v38_v3 }
  0x9a   :  { %v40_v5 = vpop.xlane.xlu0 %39 }
  0x9b   :  { %v42_v6 = vadd.f32 %v41_v4, %v40_v5 }
  0x9d   :  { %44 = vst.msk [vmem:[%s110_s3] sm:$0xff] %vm43_vm1, %v42_v6 }
  0x9e   :  { %49 = vsyncpa [#allocation4], 1 }

</bundles_post_ra>
